<compile_context>
chip_gen: v7x
topology: tpu7x:2x2x1
jax: 0.10.0
libtpu: 0.0.40
codegen_flags: <defaults>
</compile_context>

<pallas_src>
import functools

import jax
import jax.numpy as jnp
from jax import lax
from jax.experimental import pallas as pl
from jax.experimental.pallas import tpu as pltpu


# ----------------------------------------------------------------------------
# Static combinatorial structure (pure Python, identical to the PyTorch code).
# ----------------------------------------------------------------------------
def sources_and_subsets_nodes(N):
    str1 = "{0:{fill}" + str(N) + "b}"
    a = []
    for i in range(1, 2 ** N):
        a.append(str1.format(i, fill="0"))
    sourcesInNode = []
    sourcesNotInNode = []
    subset = []
    sourceList = list(range(N))

    def node_subset(node, sourcesInNodes):
        return [node - 2 ** i for i in sourcesInNodes]

    def string_to_integer_array(s, ch):
        n = len(s)
        return [n - i - 1 for i, ltr in enumerate(s) if ltr == ch]

    for j in range(len(a)):
        idxLR = string_to_integer_array(a[j], "1")
        sourcesInNode.append(idxLR)
        sourcesNotInNode.append(list(set(sourceList) - set(idxLR)))
        subset.append(node_subset(j, idxLR))
    return (sourcesInNode, subset)


# ----------------------------------------------------------------------------
# Fuzzy-measure construction (chi_nn_vars) — parameter-only setup, plain JAX.
# Sequential recurrence over 2**N_in - 2 nodes with subset-dependent indices.
# TODO(synk): kept outside the kernel (data-independent, O(2**N_in * N_out)).
# ----------------------------------------------------------------------------
def build_FM(chi_vars, N_in, N_out, subset):
    chi_vars = jnp.abs(chi_vars)
    nVars = 2 ** N_in - 2
    rows = [chi_vars[0, :]]
    for i in range(1, nVars):
        indices = list(subset[i])
        if len(indices) == 1:
            rows.append(chi_vars[i, :])
        else:
            maxVal = jnp.max(jnp.stack([rows[j] for j in indices], axis=0), axis=0)
            rows.append(maxVal + chi_vars[i, :])
    rows.append(jnp.ones((N_out,), chi_vars.dtype))
    FM = jnp.stack(rows, axis=0)          # (2**N_in - 1, N_out)
    FM = jnp.minimum(FM, 1.0)
    return FM


# ----------------------------------------------------------------------------
# Pallas kernel: per `chunk`-lane slice of the big VMEM block —
#   fused descending sort (compare-exchange network along N_in, tracking the
#   2**original_index weights), sorted-difference scatter via a one-hot select
#   against a sublane iota, then a lane-dense (N_out, K) @ (K, chunk) matmul.
# ----------------------------------------------------------------------------
def choquet_kernel(x_ref, fmt_ref, o_ref, *, n_in, k_cols, chunk):
    """x_ref: (N_in, tm) f32, fmt_ref: (N_out, K) f32, o_ref: (N_out, tm)."""
    tm = x_ref.shape[1]
    n_chunks = tm // chunk

    # Grid-invariant / chunk-invariant values, hoisted out of the chunk loop.
    fmt = fmt_ref[...].astype(jnp.float32)                        # (N_out, K)
    row = lax.broadcasted_iota(jnp.int32, (k_cols, chunk), 0)     # sublane iota

    @pl.loop(0, n_chunks)
    def _(c):
        start = pl.multiple_of(c * chunk, 128)
        x = x_ref[:, pl.ds(start, chunk)].astype(jnp.float32)     # (n_in, chunk)

        # Per-position rows and their 2**original_index weights (int32 — exact
        # for any realistic N_in < 31).
        vals = [x[i:i + 1, :] for i in range(n_in)]
        wts = [jnp.full((1, chunk), 2 ** i, jnp.int32) for i in range(n_in)]

        # Fused descending sort: full-lane VPU compare-exchanges.  Values use
        # max/min (single VPU ops); the compare is kept only for the weights.
        for i in range(n_in):
            for j in range(i + 1, n_in):
                swap = vals[j] > vals[i]
                vi = jnp.maximum(vals[i], vals[j])
                vj = jnp.minimum(vals[i], vals[j])
                wi = jnp.where(swap, wts[j], wts[i])
                wj = jnp.where(swap, wts[i], wts[j])
                vals[i], vals[j] = vi, vj
                wts[i], wts[j] = wi, wj

        # Scatter sorted differences: column index = cumsum(2**sortInd) - 1,
        # which is strictly increasing per lane, so plain selects never collide.
        zero = jnp.zeros((1, chunk), jnp.float32)
        acc = wts[0]
        nxt = vals[1] if n_in > 1 else zero
        data = jnp.where(row == (acc - 1), vals[0] - nxt, 0.0)    # (K, chunk)
        for k in range(1, n_in):
            nxt = vals[k + 1] if k + 1 < n_in else zero
            acc = acc + wts[k]
            data = jnp.where(row == (acc - 1), vals[k] - nxt, data)

        # Lane-dense matmul: (N_out, K) @ (K, chunk) -> (N_out, chunk).
        out = jnp.dot(fmt, data, preferred_element_type=jnp.float32)
        o_ref[:, pl.ds(start, chunk)] = out.astype(o_ref.dtype)


# ----------------------------------------------------------------------------
# Wrappers.
# ----------------------------------------------------------------------------
def _round_up(x, m):
    return ((x + m - 1) // m) * m


def choquet_forward_fb(x_fm, fm_t, *, tm=32768, chunk=512):
    """Core kernel, (features, batch) layout: x_fm (N_in, M), fm_t (N_out, K) -> (N_out, M)."""
    N_in, M = x_fm.shape
    N_out, K = fm_t.shape
    assert K == 2 ** N_in - 1
    assert N_in < 31  # 2**i weights are int32

    chunk = _round_up(max(128, min(chunk, tm)), 128)
    tm_eff = _round_up(min(tm, _round_up(M, chunk)), chunk)
    grid = (pl.cdiv(M, tm_eff),)   # partial trailing block handled by Pallas

    kernel = functools.partial(choquet_kernel, n_in=N_in, k_cols=K, chunk=chunk)

    return pl.pallas_call(
        kernel,
        out_shape=jax.ShapeDtypeStruct((N_out, M), x_fm.dtype),
        grid_spec=pltpu.PrefetchScalarGridSpec(
            num_scalar_prefetch=0,
            grid=grid,
            in_specs=[
                # Sweep pipeline_mode=pl.Buffered(3) here if the profile still
                # shows exposed input DMA after the tile enlargement.
                pl.BlockSpec((N_in, tm_eff), lambda i: (0, i)),
                pl.BlockSpec((N_out, K), lambda i: (0, 0)),      # grid-invariant
            ],
            out_specs=pl.BlockSpec((N_out, tm_eff), lambda i: (0, i)),
        ),
        compiler_params=pltpu.CompilerParams(dimension_semantics=("parallel",)),
    )(x_fm, fm_t)


def choquet_forward(inputs, FM, *, tm=32768, chunk=512):
    """Module-compatible interface: inputs (M, N_in) -> (M, N_out).

    NOTE: in an end-to-end model keep activations in (features, batch) layout
    and call choquet_forward_fb directly; the two transposes below are extra
    HBM passes that exist only to preserve the nn.Module (M, N) interface.
    """
    out_fb = choquet_forward_fb(inputs.T, FM.T.astype(jnp.float32),
                                tm=tm, chunk=chunk)
    return out_fb.T


# ----------------------------------------------------------------------------
# Pure-JAX reference (mirrors the PyTorch forward) for a correctness check.
# ----------------------------------------------------------------------------
def choquet_reference(inputs, FM):
    M, _ = inputs.shape
    K = FM.shape[0]
    order = jnp.argsort(-inputs, axis=1)
    sv = jnp.take_along_axis(inputs, order, axis=1)
    sv = jnp.concatenate([sv, jnp.zeros((M, 1), sv.dtype)], axis=1)
    diff = sv[:, :-1] - sv[:, 1:]
    out_idx = jnp.cumsum(2 ** order, axis=1) - 1
    data = jnp.zeros((M, K), inputs.dtype)
    data = data.at[jnp.arange(M)[:, None], out_idx].set(diff)
    return data @ FM


if __name__ == "__main__":
    N_in, N_out = 4, 3
    nVars = 2 ** N_in - 2

    # Deterministic parameter init, same as the module's __init__:
    # vars = (1 / N_in) * ones((nVars, N_out))
    chi_vars = (1.0 / N_in) * jnp.ones((nVars, N_out), jnp.float32)
    _, subset = sources_and_subsets_nodes(N_in)
    FM = build_FM(chi_vars, N_in, N_out, subset)      # (2**N_in - 1, N_out)

    key = jax.random.PRNGKey(0)
    k1, k2 = jax.random.split(key)

    # Case 1: small batch (not a multiple of 128) — single grid step / chunk.
    M1 = 300
    x1 = jax.random.uniform(k1, (M1, N_in), jnp.float32)
    out1 = jax.block_until_ready(choquet_forward(x1, FM))
    ref1 = choquet_reference(x1, FM)
    assert out1.shape == (M1, N_out)
    assert jnp.allclose(out1, ref1, atol=1e-5, rtol=1e-5)

    # Case 2: multiple grid steps, multiple chunks per block, partial tail block.
    M2 = 1500
    x2 = jax.random.uniform(k2, (M2, N_in), jnp.float32)
    out2 = jax.block_until_ready(choquet_forward(x2, FM, tm=512, chunk=256))
    ref2 = choquet_reference(x2, FM)
    assert out2.shape == (M2, N_out)
    assert jnp.allclose(out2, ref2, atol=1e-5, rtol=1e-5)

    print("KERNEL_OK")
</pallas_src>

<mosaic_0001>
module attributes {stable_mosaic.version = 11 : i64} {
  func.func @choquet_kernel(%arg0: i32, %arg1: memref<4x512xf32, #tpu.memory_space<vmem>>, %arg2: memref<3x15xf32, #tpu.memory_space<vmem>>, %arg3: memref<3x512xf32, #tpu.memory_space<vmem>>) attributes {dimension_semantics = [#tpu.dimension_semantics<parallel>], iteration_bounds = array<i64: 1>, scalar_prefetch = 0 : i64, scratch_operands = 0 : i64, tpu.core_type = #tpu.core_type<tc>, window_params = [{transform_indices = @transform_0, window_bounds = array<i64: 4, 512>}, {pipeline_mode = #tpu.pipeline_mode<synchronous>, transform_indices = @transform_1, window_bounds = array<i64: 3, 15>}, {transform_indices = @transform_2, window_bounds = array<i64: 3, 512>}]} {
    %c0 = arith.constant 0 : index
    %c0_0 = arith.constant 0 : index
    %0 = vector.load %arg2[%c0, %c0_0] : memref<3x15xf32, #tpu.memory_space<vmem>>, vector<3x15xf32>
    %1 = tpu.iota {dimensions = array<i32: 0>} : vector<15x512xi32>
    %c0_i32 = arith.constant 0 : i32
    %c1_i32 = arith.constant 1 : i32
    %2 = arith.muli %c0_i32, %c1_i32 : i32
    %c0_i32_1 = arith.constant 0 : i32
    %3 = arith.addi %c0_i32_1, %2 : i32
    %c512_i32 = arith.constant 512 : i32
    %4 = arith.muli %3, %c512_i32 : i32
    %5 = tpu.assume_multiple %4, 128 : i32
    %c0_2 = arith.constant 0 : index
    %6 = arith.index_cast %5 : i32 to index
    %7 = vector.load %arg1[%c0_2, %6] : memref<4x512xf32, #tpu.memory_space<vmem>>, vector<4x512xf32>
    %8 = vector.extract_strided_slice %7 {offsets = [0, 0], sizes = [1, 512], strides = [1, 1]} : vector<4x512xf32> to vector<1x512xf32>
    %9 = vector.extract_strided_slice %7 {offsets = [1, 0], sizes = [1, 512], strides = [1, 1]} : vector<4x512xf32> to vector<1x512xf32>
    %10 = vector.extract_strided_slice %7 {offsets = [2, 0], sizes = [1, 512], strides = [1, 1]} : vector<4x512xf32> to vector<1x512xf32>
    %11 = vector.extract_strided_slice %7 {offsets = [3, 0], sizes = [1, 512], strides = [1, 1]} : vector<4x512xf32> to vector<1x512xf32>
    %c1_i32_3 = arith.constant 1 : i32
    %12 = vector.broadcast %c1_i32_3 : i32 to vector<1x512xi32>
    %c2_i32 = arith.constant 2 : i32
    %13 = vector.broadcast %c2_i32 : i32 to vector<1x512xi32>
    %c4_i32 = arith.constant 4 : i32
    %14 = vector.broadcast %c4_i32 : i32 to vector<1x512xi32>
    %c8_i32 = arith.constant 8 : i32
    %15 = vector.broadcast %c8_i32 : i32 to vector<1x512xi32>
    %16 = arith.cmpf ogt, %9, %8 : vector<1x512xf32>
    %17 = arith.maximumf %8, %9 : vector<1x512xf32>
    %18 = arith.minimumf %8, %9 : vector<1x512xf32>
    %19 = arith.select %16, %13, %12 : vector<1x512xi1>, vector<1x512xi32>
    %20 = arith.select %16, %12, %13 : vector<1x512xi1>, vector<1x512xi32>
    %21 = arith.cmpf ogt, %10, %17 : vector<1x512xf32>
    %22 = arith.maximumf %17, %10 : vector<1x512xf32>
    %23 = arith.minimumf %17, %10 : vector<1x512xf32>
    %24 = arith.select %21, %14, %19 : vector<1x512xi1>, vector<1x512xi32>
    %25 = arith.select %21, %19, %14 : vector<1x512xi1>, vector<1x512xi32>
    %26 = arith.cmpf ogt, %11, %22 : vector<1x512xf32>
    %27 = arith.maximumf %22, %11 : vector<1x512xf32>
    %28 = arith.minimumf %22, %11 : vector<1x512xf32>
    %29 = arith.select %26, %15, %24 : vector<1x512xi1>, vector<1x512xi32>
    %30 = arith.select %26, %24, %15 : vector<1x512xi1>, vector<1x512xi32>
    %31 = arith.cmpf ogt, %23, %18 : vector<1x512xf32>
    %32 = arith.maximumf %18, %23 : vector<1x512xf32>
    %33 = arith.minimumf %18, %23 : vector<1x512xf32>
    %34 = arith.select %31, %25, %20 : vector<1x512xi1>, vector<1x512xi32>
    %35 = arith.select %31, %20, %25 : vector<1x512xi1>, vector<1x512xi32>
    %36 = arith.cmpf ogt, %28, %32 : vector<1x512xf32>
    %37 = arith.maximumf %32, %28 : vector<1x512xf32>
    %38 = arith.minimumf %32, %28 : vector<1x512xf32>
    %39 = arith.select %36, %30, %34 : vector<1x512xi1>, vector<1x512xi32>
    %40 = arith.select %36, %34, %30 : vector<1x512xi1>, vector<1x512xi32>
    %41 = arith.cmpf ogt, %38, %33 : vector<1x512xf32>
    %42 = arith.maximumf %33, %38 : vector<1x512xf32>
    %43 = arith.minimumf %33, %38 : vector<1x512xf32>
    %44 = arith.select %41, %40, %35 : vector<1x512xi1>, vector<1x512xi32>
    %45 = arith.select %41, %35, %40 : vector<1x512xi1>, vector<1x512xi32>
    %cst = arith.constant 0.000000e+00 : f32
    %46 = vector.broadcast %cst : f32 to vector<1x512xf32>
    %c1_i32_4 = arith.constant 1 : i32
    %47 = vector.broadcast %c1_i32_4 : i32 to vector<1x512xi32>
    %48 = arith.subi %29, %47 : vector<1x512xi32>
    %49 = vector.broadcast %48 : vector<1x512xi32> to vector<15x512xi32>
    %50 = arith.cmpi eq, %1, %49 : vector<15x512xi32>
    %51 = arith.subf %27, %37 : vector<1x512xf32>
    %cst_5 = arith.constant 0.000000e+00 : f32
    %52 = vector.shape_cast %51 : vector<1x512xf32> to vector<1x512xf32>
    %53 = vector.broadcast %52 : vector<1x512xf32> to vector<15x512xf32>
    %54 = vector.broadcast %cst_5 : f32 to vector<15x512xf32>
    %55 = arith.select %50, %53, %54 : vector<15x512xi1>, vector<15x512xf32>
    %56 = arith.addi %29, %39 : vector<1x512xi32>
    %c1_i32_6 = arith.constant 1 : i32
    %57 = vector.broadcast %c1_i32_6 : i32 to vector<1x512xi32>
    %58 = arith.subi %56, %57 : vector<1x512xi32>
    %59 = vector.broadcast %58 : vector<1x512xi32> to vector<15x512xi32>
    %60 = arith.cmpi eq, %1, %59 : vector<15x512xi32>
    %61 = arith.subf %37, %42 : vector<1x512xf32>
    %62 = vector.shape_cast %61 : vector<1x512xf32> to vector<1x512xf32>
    %63 = vector.broadcast %62 : vector<1x512xf32> to vector<15x512xf32>
    %64 = arith.select %60, %63, %55 : vector<15x512xi1>, vector<15x512xf32>
    %65 = arith.addi %56, %44 : vector<1x512xi32>
    %c1_i32_7 = arith.constant 1 : i32
    %66 = vector.broadcast %c1_i32_7 : i32 to vector<1x512xi32>
    %67 = arith.subi %65, %66 : vector<1x512xi32>
    %68 = vector.broadcast %67 : vector<1x512xi32> to vector<15x512xi32>
    %69 = arith.cmpi eq, %1, %68 : vector<15x512xi32>
    %70 = arith.subf %42, %43 : vector<1x512xf32>
    %71 = vector.shape_cast %70 : vector<1x512xf32> to vector<1x512xf32>
    %72 = vector.broadcast %71 : vector<1x512xf32> to vector<15x512xf32>
    %73 = arith.select %69, %72, %64 : vector<15x512xi1>, vector<15x512xf32>
    %74 = arith.addi %65, %45 : vector<1x512xi32>
    %c1_i32_8 = arith.constant 1 : i32
    %75 = vector.broadcast %c1_i32_8 : i32 to vector<1x512xi32>
    %76 = arith.subi %74, %75 : vector<1x512xi32>
    %77 = vector.broadcast %76 : vector<1x512xi32> to vector<15x512xi32>
    %78 = arith.cmpi eq, %1, %77 : vector<15x512xi32>
    %79 = arith.subf %43, %46 : vector<1x512xf32>
    %80 = vector.shape_cast %79 : vector<1x512xf32> to vector<1x512xf32>
    %81 = vector.broadcast %80 : vector<1x512xf32> to vector<15x512xf32>
    %82 = arith.select %78, %81, %73 : vector<15x512xi1>, vector<15x512xf32>
    %cst_9 = arith.constant dense<0.000000e+00> : vector<3x512xf32>
    %83 = tpu.matmul %0, %82, %cst_9 {dimension_numbers = #tpu.dot_dimension_numbers<[1], [0], [0], [1], [0, 0, 1, 1], [], []>} : vector<3x15xf32>, vector<15x512xf32>, vector<3x512xf32> -> vector<3x512xf32>
    %c0_10 = arith.constant 0 : index
    %84 = arith.index_cast %5 : i32 to index
    %85 = vector.load %arg3[%c0_10, %84] : memref<3x512xf32, #tpu.memory_space<vmem>>, vector<3x512xf32>
    tpu.vector_store %arg3[%c0_10, %84], %83 {strides = array<i32>} : memref<3x512xf32, #tpu.memory_space<vmem>>, vector<3x512xf32>,
    %c1_i32_11 = arith.constant 1 : i32
    return
  }
  func.func @transform_0(%arg0: i32) -> (i32, i32) {
    %c0_i32 = arith.constant 0 : i32
    %c0_i32_0 = arith.constant 0 : i32
    return %c0_i32, %arg0 : i32, i32
  }
  func.func @transform_1(%arg0: i32) -> (i32, i32) {
    %c0_i32 = arith.constant 0 : i32
    %c0_i32_0 = arith.constant 0 : i32
    %c0_i32_1 = arith.constant 0 : i32
    return %c0_i32, %c0_i32_0 : i32, i32
  }
  func.func @transform_2(%arg0: i32) -> (i32, i32) {
    %c0_i32 = arith.constant 0 : i32
    %c0_i32_0 = arith.constant 0 : i32
    return %c0_i32, %arg0 : i32, i32
  }
}

</mosaic_0001>

<bundles_post_ra>
// kernel: tpu_custom_call.1
= control target key start
LH: loop header
LB: loop body
LE: loop exit
PB: predicated region body
PF: predicated region fallthrough
CT: control target
= control target key end

     0   :  { %7 = vsyncpa [#allocation3], 0  ;;  %s1116_s0 = inlined_call_operand.hbm [shape: f32[4,300], index: 0, kind: input, shape index: {}]   ;;  %s1117_s1 = inlined_call_operand.hbm [shape: f32[3,15], index: 1, kind: input, shape index: {}]   ;;  %s1118_s2 = inlined_call_operand.hbm [shape: f32[3,300], index: 2, kind: output, shape index: {}]  }
   0x1   :  { %8 = vsyncpa [#allocation6], 0 }
   0x2   :  { %9 = vsyncpa [#allocation4], 0 }
   0x3   :  { %14 = vsyncadd [#allocation3], 64  ;;  %s812_s9 = smov [#allocation2]   ;;  %s813_s11 = smov [#allocation5]  }
   0x4   :  { %s16_s10 = sshll.u32 %s812_s9, 4  ;;  %s26_s12 = sshll.u32 %s813_s11, 4  ;;  %s17_s10 = int_to_ptr.vmem [resolvable:$true] %s16_s10  ;;  %s27_s12 = int_to_ptr.vmem [resolvable:$true] %s26_s12 }
   0x5   :  { %s740_s15 = scalar_lea.hbm %s1116_s0, 192 }
   0x6   :  { %p741_p0 = scmp.ne.s32.totalorder %s1116_s0, %s740_s15  ;;  %p744_p1 = scmp.lt.u32.totalorder %s740_s15, %s1116_s0 }
   0x8   :  { %p746_p2 = pnand %p744_p1, %p741_p0 }
   0xa   :  { %749 = shalt.err (!%p746_p2)
}
   0xb   :  { %s750_s20 = scalar_lea.vmem %s17_s10, 192  ;;  %s754_s21 = scalar_lea.vmem %s17_s10, 256 }
   0xc   :  { %p751_p3 = scmp.ne.s32.totalorder %s17_s10, %s750_s20  ;;  %p755_p4 = scmp.lt.s32.totalorder %s17_s10, %s17_s10 }
   0xd   :  { %p756_p5 = scmp.lt.s32.totalorder %s754_s21, %s750_s20 }
   0xf   :  { %p757_p6 = por %p756_p5, %p755_p4 }
  0x11   :  { %p758_p7 = pnand %p757_p6, %p751_p3 }
  0x13   :  { %761 = shalt.err (!%p758_p7)
}
  0x14   :  { %19 = dma.hbm_to_vmem [thread:$0]  %s1116_s0, 192, %s17_s10, [#allocation3]  }
  0x15   :  { %s762_s26 = scalar_lea.hbm %s1117_s1, 64 }
  0x16   :  { %p763_p8 = scmp.ne.s32.totalorder %s1117_s1, %s762_s26  ;;  %p766_p9 = scmp.lt.u32.totalorder %s762_s26, %s1117_s1 }
  0x18   :  { %p768_p10 = pnand %p766_p9, %p763_p8 }
  0x1a   :  { %771 = shalt.err (!%p768_p10)
}
  0x1b   :  { %s772_s3 = scalar_lea.vmem %s27_s12, 64  ;;  %p777_p12 = scmp.lt.s32.totalorder %s27_s12, %s27_s12 }
  0x1c   :  { %p773_p11 = scmp.ne.s32.totalorder %s27_s12, %s772_s3  ;;  %p778_p13 = scmp.lt.s32.totalorder %s772_s3, %s772_s3 }
  0x1e   :  { %p779_p0 = por %p778_p13, %p777_p12 }
  0x20   :  { %p780_p1 = pnand %p779_p0, %p773_p11 }
  0x22   :  { %783 = shalt.err (!%p780_p1)
}
  0x23   :  { %29 = dma.hbm_to_vmem [thread:$0]  %s1117_s1, 64, %s27_s12, [#allocation6]  }
  0x24   :  { %806 = dma.done.wait [#allocation3], 256  }
  0x25   :  { %807 = vsyncadd [#allocation3], 4294967040 }
  0x26   :  { %808 = dma.done.wait [#allocation6], 64  }
  0x27   :  { %809 = vsyncadd [#allocation6], 4294967232  ;;  %v37_v0 = vlaneseq  ;;  %v814_v1 = vmov 0.0   ;;  %v40_v4 = vld [vmem:[#allocation2] sm:$0xff]  ;;  %v869_v7 = vld [vmem:[#allocation2 + $0x8] sm:$0xff]  ;;  %v815_v19 = vmov 1  }
  0x28   :  { %603 = vmatprep.mubr.f32.mxu0 %v814_v1  ;;  %674 = vmatprep.mubr.f32.mxu1 %v814_v1  ;;  %v44_v8 = vrot.slane %v40_v4, 7  ;;  %v50_v9 = vrot.slane %v40_v4, 5  ;;  %v72_v10 = vrot.slane %v40_v4, 6  ;;  %v45_v11 = vrot.slane %v869_v7, 7 }
  0x29   :  { %v858_v2 = vshrl.u32 %v37_v0, 7  ;;  %v52_v14 = vrot.slane %v869_v7, 5  ;;  %v74_v15 = vrot.slane %v869_v7, 6  ;;  %v816_v21 = vmov 2  }
  0x2a   :  { %vm48_vm0 = vcmp.gt.f32.partialorder %v40_v4, %v44_v8  ;;  %v51_v16 = vrot.slane %v50_v9, 4  ;;  %v73_v17 = vrot.slane %v72_v10, 4  ;;  %v96_v18 = vrot.slane %v44_v8, 4 }
  0x2b   :  { %v861_v3 = vadd.s32 8, %v858_v2  ;;  %v864_v5 = vsub.s32 3, %v858_v2  ;;  %v867_v6 = vsub.s32 7, %v858_v2  ;;  %v873_v12 = vsub.s32 0, %v858_v2 }
  0x2c   :  { %v876_v13 = vsub.s32 4, %v858_v2  ;;  %v60_v20 = vsel %vm48_vm0, 2, %v815_v19  ;;  %v62_v22 = vsel %vm48_vm0, 1, %v816_v21  ;;  %vm49_vm1 = vcmp.gt.f32.partialorder %v869_v7, %v45_v11 }
  0x2d   :  { %v53_v23 = vrot.slane %v52_v14, 4  ;;  %v56_v24 = vmax.f32 %v40_v4, %v51_v16  ;;  %v58_v25 = vmin.f32 %v40_v4, %v51_v16  ;;  %v82_v26 = vrot.slane %v60_v20, 7 }
  0x2e   :  { %v120_v27 = vrot.slane %v62_v22, 5  ;;  %v885_v30 = vsel %vm49_vm1, 2, %v815_v19  ;;  %v887_v31 = vsel %vm49_vm1, 1, %v816_v21  ;;  %v75_v37 = vrot.slane %v74_v15, 4 }
  0x2f   :  { %v57_v28 = vmax.f32 %v869_v7, %v53_v23  ;;  %v883_v29 = vmin.f32 %v869_v7, %v53_v23  ;;  %v66_v32 = vrot.slane %v56_v24, 6  ;;  %v78_v33 = vmax.f32 %v56_v24, %v73_v17 }
  0x30   :  { %v80_v34 = vmin.f32 %v56_v24, %v73_v17  ;;  %v121_v35 = vrot.slane %v120_v27, 4  ;;  %v83_v38 = vrot.slane %v885_v30, 7  ;;  %v890_v39 = vrot.slane %v45_v11, 4 }
  0x31   :  { %v67_v36 = vrot.slane %v57_v28, 6  ;;  %vm70_vm2 = vcmp.gt.f32.partialorder %v40_v4, %v66_v32  ;;  %v90_v40 = vrot.slane %v78_v33, 5  ;;  %v100_v41 = vmax.f32 %v78_v33, %v96_v18 }
  0x32   :  { %v102_v42 = vmin.f32 %v78_v33, %v96_v18  ;;  %v84_v43 = vsel %vm70_vm2, 4, %v82_v26  ;;  %v86_v44 = vsel %vm70_vm2, %v82_v26, 4  ;;  %vm110_vm3 = vcmp.gt.f32.partialorder %v80_v34, %v58_v25 }
  0x33   :  { %v112_v45 = vmax.f32 %v58_v25, %v80_v34  ;;  %vm94_vm4 = vcmp.gt.f32.partialorder %v40_v4, %v90_v40  ;;  %v104_v46 = vrot.slane %v84_v43, 7  ;;  %v114_v47 = vmin.f32 %v58_v25, %v80_v34 }
  0x34   :  { %v116_v48 = vrot.slane %v86_v44, 6  ;;  %vm893_vm6 = vcmp.gt.f32.partialorder %v869_v7, %v67_v36  ;;  %v897_v55 = vmax.f32 %v57_v28, %v75_v37  ;;  %v81_v10 = vmin.f32 %v57_v28, %v75_v37 }
  0x35   :  { %vm128_vm5 = vcmp.gt.f32.partialorder %v102_v42, %v112_v45  ;;  %v130_v49 = vmax.f32 %v112_v45, %v102_v42  ;;  %v132_v50 = vmin.f32 %v112_v45, %v102_v42  ;;  %v106_v52 = vsel %vm94_vm4, 8, %v104_v46 }
  0x36   :  { %v108_v53 = vsel %vm94_vm4, %v104_v46, 8  ;;  %v117_v54 = vrot.slane %v116_v48, 4  ;;  %v903_v61 = vadd.s32 4294967295, %v106_v52  ;;  %v85_v11 = vsel %vm893_vm6, 4, %v83_v38 }
  0x37   :  { %v134_v56 = vrot.slane %v108_v53, 7  ;;  %vm142_vm7 = vcmp.gt.f32.partialorder %v132_v50, %v114_v47  ;;  %v144_v57 = vmax.f32 %v114_v47, %v132_v50  ;;  %v899_v58 = vmin.f32 %v114_v47, %v132_v50 }
  0x38   :  { %v124_v59 = vsel %vm110_vm3, %v117_v54, %v121_v35  ;;  %v126_v60 = vsel %vm110_vm3, %v121_v35, %v117_v54  ;;  %v905_v62 = vsub.f32 %v100_v41, %v130_v49  ;;  %v161_v8 = vrot.slane %v903_v61, %v867_v6 }
  0x39   :  { %v135_v63 = vrot.slane %v134_v56, 4  ;;  %v907_v0 = vsub.f32 %v130_v49, %v144_v57  ;;  %v910_v1 = vsub.f32 %v144_v57, %v899_v58  ;;  %v485_v4 = vrot.slane %v899_v58, %v876_v13 }
  0x3a   :  { %v205_v9 = vrot.slane %v905_v62, %v876_v13  ;;  %v177_v20 = vrot.slane %v161_v8, %v864_v5  ;;  %v87_v33 = vsel %vm893_vm6, %v83_v38, 4  ;;  %v91_v34 = vrot.slane %v897_v55, 5 }
  0x3b   :  { %v138_v14 = vsel %vm128_vm5, %v135_v63, %v124_v59  ;;  %v140_v15 = vsel %vm128_vm5, %v124_v59, %v135_v63  ;;  %v299_v16 = vrot.slane %v907_v0, %v876_v13  ;;  %v393_v17 = vrot.slane %v910_v1, %v876_v13 }
  0x3c   :  { %v148_v18 = vsel %vm142_vm7, %v140_v15, %v126_v60  ;;  %v150_v19 = vsel %vm142_vm7, %v126_v60, %v140_v15  ;;  %v225_v21 = vrot.slane %v205_v9, %v873_v12  ;;  %v242_v22 = vrot.slane %v138_v14, 5 }
  0x3d   :  { %v319_v23 = vrot.slane %v299_v16, %v873_v12  ;;  %v336_v24 = vrot.slane %v148_v18, 5  ;;  %v413_v25 = vrot.slane %v393_v17, %v873_v12  ;;  %vm187_vm8 = vcmp.eq.s32.totalorder %v858_v2, %v177_v20 }
  0x3e   :  { %vm191_vm9 = vcmp.eq.s32.totalorder %v861_v3, %v177_v20  ;;  %v430_v26 = vrot.slane %v150_v19, 5  ;;  %v505_v27 = vrot.slane %v485_v4, %v873_v12  ;;  %v235_v28 = vsel %vm187_vm8, %v225_v21, 0.0 }
  0x3f   :  { %v239_v30 = vsel %vm191_vm9, %v225_v21, 0.0  ;;  %v244_v32 = vadd.s32 %v242_v22, %v106_v52  ;;  %v101_v35 = vmax.f32 %v897_v55, %v890_v39  ;;  %v103_v36 = vmin.f32 %v897_v55, %v890_v39 }
  0x40   :  { %v105_v37 = vrot.slane %v85_v11, 7  ;;  %vm526_vm10 = vcmask 1046528   ;;  %vm111_vm11 = vcmp.gt.f32.partialorder %v81_v10, %v883_v29  ;;  %v113_v42 = vmax.f32 %v883_v29, %v81_v10 }
  0x41   :  { %v942_v40 = vadd.s32 4294967295, %v244_v32  ;;  %v338_v41 = vadd.s32 %v336_v24, %v244_v32  ;;  %vm95_vm12 = vcmp.gt.f32.partialorder %v869_v7, %v91_v34  ;;  %v115_v38 = vmin.f32 %v883_v29, %v81_v10 }
  0x42   :  { %v118_v43 = vrot.slane %v87_v33, 6  ;;  %v122_v44 = vrot.slane %v887_v31, 5  ;;  %v107_v47 = vsel %vm95_vm12, 8, %v105_v37  ;;  %v109_v48 = vsel %vm95_vm12, %v105_v37, 8 }
  0x43   :  { %v255_v45 = vrot.slane %v942_v40, %v867_v6  ;;  %v951_v39 = vadd.s32 4294967295, %v338_v41  ;;  %v432_v46 = vadd.s32 %v430_v26, %v338_v41  ;;  %vm129_vm13 = vcmp.gt.f32.partialorder %v103_v36, %v113_v42 }
  0x44   :  { %v119_v49 = vrot.slane %v118_v43, 4  ;;  %v123_v50 = vrot.slane %v122_v44, 4  ;;  %v131_v53 = vmax.f32 %v113_v42, %v103_v36  ;;  %v133_v55 = vmin.f32 %v113_v42, %v103_v36 }
  0x45   :  { %v271_v51 = vrot.slane %v255_v45, %v864_v5  ;;  %v349_v7 = vrot.slane %v951_v39, %v867_v6  ;;  %v956_v52 = vadd.s32 4294967295, %v432_v46  ;;  %v136_v56 = vrot.slane %v109_v48, 7 }
  0x46   :  { %v125_v31 = vsel %vm111_vm11, %v119_v49, %v123_v50  ;;  %v127_v54 = vsel %vm111_vm11, %v123_v50, %v119_v49  ;;  %vm143_vm0 = vcmp.gt.f32.partialorder %v133_v55, %v115_v38  ;;  %v145_v8 = vmax.f32 %v115_v38, %v133_v55 }
  0x47   :  { %vm281_vm14 = vcmp.eq.s32.totalorder %v858_v2, %v271_v51  ;;  %vm285_vm15 = vcmp.eq.s32.totalorder %v861_v3, %v271_v51  ;;  %v365_v57 = vrot.slane %v349_v7, %v864_v5  ;;  %v443_v59 = vrot.slane %v956_v52, %v867_v6 }
  0x48   :  { %v329_v60 = vsel %vm281_vm14, %v319_v23, %v235_v28  ;;  %v333_v63 = vsel %vm285_vm15, %v319_v23, %v239_v30  ;;  %v137_v4 = vrot.slane %v136_v56, 4  ;;  %v974_v15 = vmin.f32 %v115_v38, %v133_v55 }
  0x49   :  { %vm375_vm1 = vcmp.eq.s32.totalorder %v858_v2, %v365_v57  ;;  %vm379_vm2 = vcmp.eq.s32.totalorder %v861_v3, %v365_v57  ;;  %v459_v29 = vrot.slane %v443_v59, %v864_v5  ;;  %vm817_vm5 = vmmov 1  }
  0x4a   :  { %v423_v9 = vsel %vm375_vm1, %v413_v25, %v329_v60  ;;  %v427_v10 = vsel %vm379_vm2, %v413_v25, %v333_v63  ;;  %v139_v11 = vsel %vm129_vm13, %v137_v4, %v125_v31  ;;  %v141_v14 = vsel %vm129_vm13, %v125_v31, %v137_v4  ;;  %vm978_vm6 = vmpackc.low %vm526_vm10, %vm817_vm5 }
  0x4b   :  { %vm469_vm3 = vcmp.eq.s32.totalorder %v858_v2, %v459_v29  ;;  %vm473_vm4 = vcmp.eq.s32.totalorder %v861_v3, %v459_v29  ;;  %v149_v16 = vsel %vm143_vm0, %v141_v14, %v127_v54  ;;  %v151_v20 = vsel %vm143_vm0, %v127_v54, %v141_v14 }
  0x4c   :  { %v515_v17 = vsel %vm469_vm3, %v505_v27, %v423_v9  ;;  %v519_v18 = vsel %vm473_vm4, %v505_v27, %v427_v10  ;;  %v983_v21 = vadd.s32 4294967295, %v107_v47  ;;  %v985_v23 = vsub.f32 %v101_v35, %v131_v53 }
  0x4d   :  { %v721_v22 = vpack.c.bf16 %v519_v18, %v515_v17  ;;  %v243_v24 = vrot.slane %v139_v11, 5  ;;  %v987_v25 = vsub.f32 %v131_v53, %v145_v8  ;;  %v337_v27 = vrot.slane %v149_v16, 5 }
  0x4e   :  { %v169_v26 = vrot.slane %v983_v21, %v867_v6  ;;  %v992_v28 = vsub.f32 %v145_v8, %v974_v15  ;;  %v431_v30 = vrot.slane %v151_v20, 5  ;;  %v213_v32 = vrot.slane %v985_v23, %v876_v13 }
  0x4f   :  { %723 = vmatprep.subr.msk.bf16.mxu0 %vm978_vm6, %v721_v22  ;;  %v245_v33 = vadd.s32 %v243_v24, %v107_v47  ;;  %v307_v34 = vrot.slane %v987_v25, %v876_v13  ;;  %v493_v35 = vrot.slane %v974_v15, %v876_v13  ;;  %v157_v41 = vrot.slane %v903_v61, %v864_v5 }
  0x50   :  { %v185_v36 = vrot.slane %v169_v26, %v864_v5  ;;  %v401_v37 = vrot.slane %v992_v28, %v876_v13  ;;  %v201_v42 = vrot.slane %v905_v62, %v873_v12  ;;  %v233_v38 = vrot.slane %v213_v32, %v873_v12 }
  0x51   :  { %v1010_v43 = vadd.s32 4294967295, %v245_v33  ;;  %v327_v44 = vrot.slane %v307_v34, %v873_v12  ;;  %v339_v45 = vadd.s32 %v337_v27, %v245_v33  ;;  %v513_v13 = vrot.slane %v493_v35, %v873_v12 }
  0x52   :  { %vm189_vm7 = vcmp.eq.s32.totalorder %v858_v2, %v185_v36  ;;  %vm193_vm8 = vcmp.eq.s32.totalorder %v861_v3, %v185_v36  ;;  %v421_v46 = vrot.slane %v401_v37, %v873_v12  ;;  %v173_v50 = vrot.slane %v157_v41, %v864_v5 }
  0x53   :  { %v237_v47 = vsel %vm189_vm7, %v233_v38, 0.0  ;;  %v241_v61 = vsel %vm193_vm8, %v233_v38, 0.0  ;;  %v263_v62 = vrot.slane %v1010_v43, %v867_v6  ;;  %v1019_v48 = vadd.s32 4294967295, %v339_v45 }
  0x54   :  { %v433_v49 = vadd.s32 %v431_v30, %v339_v45  ;;  %v221_v51 = vrot.slane %v201_v42, %v873_v12  ;;  %v251_v7 = vrot.slane %v942_v40, %v864_v5  ;;  %v295_v54 = vrot.slane %v907_v0, %v873_v12  ;;  %v36_v45 = vld [vmem:[#allocation5] sm:$0x7] }
  0x55   :  { %v279_v53 = vrot.slane %v263_v62, %v864_v5  ;;  %v357_v31 = vrot.slane %v1019_v48, %v867_v6  ;;  %v345_v55 = vrot.slane %v951_v39, %v864_v5  ;;  %vm186_vm9 = vcmp.eq.s32.totalorder %v858_v2, %v173_v50 }
  0x56   :  { %v1032_v56 = vadd.s32 4294967295, %v433_v49  ;;  %vm190_vm10 = vcmp.eq.s32.totalorder %v861_v3, %v173_v50  ;;  %v267_v57 = vrot.slane %v251_v7, %v864_v5  ;;  %v234_v59 = vsel %vm186_vm9, %v221_v51, 0.0 }
  0x57   :  { %vm283_vm11 = vcmp.eq.s32.totalorder %v858_v2, %v279_v53  ;;  %vm287_vm12 = vcmp.eq.s32.totalorder %v861_v3, %v279_v53  ;;  %v373_v40 = vrot.slane %v357_v31, %v864_v5  ;;  %v238_v63 = vsel %vm190_vm10, %v221_v51, 0.0 }
  0x58   :  { %v331_v60 = vsel %vm283_vm11, %v327_v44, %v237_v47  ;;  %v335_v0 = vsel %vm287_vm12, %v327_v44, %v241_v61  ;;  %v451_v39 = vrot.slane %v1032_v56, %v867_v6  ;;  %vm280_vm15 = vcmp.eq.s32.totalorder %v858_v2, %v267_v57 }
  0x59   :  { %vm377_vm13 = vcmp.eq.s32.totalorder %v858_v2, %v373_v40  ;;  %vm381_vm14 = vcmp.eq.s32.totalorder %v861_v3, %v373_v40  ;;  %vm284_vm0 = vcmp.eq.s32.totalorder %v861_v3, %v267_v57  ;;  %v315_v9 = vrot.slane %v295_v54, %v873_v12 }
  0x5a   :  { %v425_v4 = vsel %vm377_vm13, %v421_v46, %v331_v60  ;;  %v429_v29 = vsel %vm381_vm14, %v421_v46, %v335_v0  ;;  %v467_v8 = vrot.slane %v451_v39, %v864_v5  ;;  %v361_v10 = vrot.slane %v345_v55, %v864_v5 }
  0x5b   :  { %v389_v6 = vrot.slane %v910_v1, %v873_v12  ;;  %v439_v11 = vrot.slane %v956_v52, %v864_v5  ;;  %v481_v14 = vrot.slane %v899_v58, %v873_v12  ;;  %v328_v16 = vsel %vm280_vm15, %v315_v9, %v234_v59 }
  0x5c   :  { %vm471_vm1 = vcmp.eq.s32.totalorder %v858_v2, %v467_v8  ;;  %vm475_vm2 = vcmp.eq.s32.totalorder %v861_v3, %v467_v8  ;;  %v332_v17 = vsel %vm284_vm0, %v315_v9, %v238_v63  ;;  %vm522_vm3 = vcmask 121856  }
  0x5d   :  { %v517_v18 = vsel %vm471_vm1, %v513_v13, %v425_v4  ;;  %v521_v20 = vsel %vm475_vm2, %v513_v13, %v429_v29  ;;  %vm374_vm4 = vcmp.eq.s32.totalorder %v858_v2, %v361_v10  ;;  %vm378_vm5 = vcmp.eq.s32.totalorder %v861_v3, %v361_v10 }
  0x5e   :  { %v727_v1 = vpack.c.bf16 %v521_v20, %v517_v18  ;;  %v409_v22 = vrot.slane %v389_v6, %v873_v12  ;;  %v455_v52 = vrot.slane %v439_v11, %v864_v5  ;;  %v501_v58 = vrot.slane %v481_v14, %v873_v12 }
  0x5f   :  { %v165_v24 = vrot.slane %v983_v21, %v864_v5  ;;  %v209_v26 = vrot.slane %v985_v23, %v873_v12  ;;  %v259_v27 = vrot.slane %v1010_v43, %v864_v5  ;;  %v303_v30 = vrot.slane %v987_v25, %v873_v12 }
  0x60   :  { %729 = vmatprep.subr.msk.bf16.mxu1 %vm978_vm6, %v727_v1  ;;  %v422_v32 = vsel %vm374_vm4, %v409_v22, %v328_v16  ;;  %v426_v33 = vsel %vm378_vm5, %v409_v22, %v332_v17  ;;  %vm468_vm7 = vcmp.eq.s32.totalorder %v858_v2, %v455_v52  ;;  %vm472_vm8 = vcmp.eq.s32.totalorder %v861_v3, %v455_v52 }
  0x61   :  { %v514_v34 = vsel %vm468_vm7, %v501_v58, %v422_v32  ;;  %v518_v21 = vsel %vm472_vm8, %v501_v58, %v426_v33  ;;  %v181_v35 = vrot.slane %v165_v24, %v864_v5  ;;  %v229_v23 = vrot.slane %v209_v26, %v873_v12 }
  0x62   :  { %v724_v36 = vpack.c.bf16 %v518_v21, %v514_v34  ;;  %v275_v37 = vrot.slane %v259_v27, %v864_v5  ;;  %v323_v25 = vrot.slane %v303_v30, %v873_v12  ;;  %v353_v41 = vrot.slane %v1019_v48, %v864_v5 }
  0x63   :  { %vm188_vm9 = vcmp.eq.s32.totalorder %v858_v2, %v181_v35  ;;  %vm192_vm10 = vcmp.eq.s32.totalorder %v861_v3, %v181_v35  ;;  %v397_v42 = vrot.slane %v992_v28, %v873_v12  ;;  %v447_v38 = vrot.slane %v1032_v56, %v864_v5 }
  0x64   :  { %726 = vmatpush1.bf16.msk.msra.mxu0 %vm978_vm6, %v724_v36  ;;  %v236_v43 = vsel %vm188_vm9, %v229_v23, 0.0  ;;  %v240_v44 = vsel %vm192_vm10, %v229_v23, 0.0  ;;  %vm282_vm11 = vcmp.eq.s32.totalorder %v858_v2, %v275_v37  ;;  %vm286_vm12 = vcmp.eq.s32.totalorder %v861_v3, %v275_v37 }
  0x65   :  { %v330_v46 = vsel %vm282_vm11, %v323_v25, %v236_v43  ;;  %v334_v13 = vsel %vm286_vm12, %v323_v25, %v240_v44  ;;  %v369_v47 = vrot.slane %v353_v41, %v864_v5  ;;  %v417_v61 = vrot.slane %v397_v42, %v873_v12 }
  0x66   :  { %v463_v28 = vrot.slane %v447_v38, %v864_v5  ;;  %v489_v62 = vrot.slane %v974_v15, %v873_v12 }
  0x67   :  { %vm376_vm13 = vcmp.eq.s32.totalorder %v858_v2, %v369_v47  ;;  %vm380_vm14 = vcmp.eq.s32.totalorder %v861_v3, %v369_v47  ;;  %717 = vmatmul.mubr.msk.f32.vlgmr.msra.gmra.mrb[0].mxu0 %vm522_vm3, %v36_v45 }
  0x68   :  { %v424_v48 = vsel %vm376_vm13, %v417_v61, %v330_v46  ;;  %v428_v49 = vsel %vm380_vm14, %v417_v61, %v334_v13  ;;  %vm470_vm15 = vcmp.eq.s32.totalorder %v858_v2, %v463_v28  ;;  %vm474_vm0 = vcmp.eq.s32.totalorder %v861_v3, %v463_v28 }
  0x69   :  { %v509_v50 = vrot.slane %v489_v62, %v873_v12 }
  0x6b   :  { %v516_v51 = vsel %vm470_vm15, %v509_v50, %v424_v48  ;;  %v520_v7 = vsel %vm474_vm0, %v509_v50, %v428_v49 }
  0x6c   :  { %v730_v5 = vpack.c.bf16 %v520_v7, %v516_v51 }
  0x6e   :  { %732 = vmatpush1.bf16.msk.msra.mxu1 %vm978_vm6, %v730_v5 }
  0x71   :  { %720 = vmatmul.mubr.msk.f32.vlgmr.msra.gmra.mrb[0].mxu1 %vm522_vm3, %v36_v45 }
 0x13a   :  { %v605_v15 = vpop.f32.mrb[0].mxu0 }
 0x13b   :  { %v607_v53 = vpop.f32.mrb[1].mxu0 }
 0x13c   :  { %v685_v31 = vcombine.low %v605_v15, %v607_v53 }
 0x13e   :  { %689 = vst [vmem:[#allocation7] sm:$0x77] %v685_v31 }
 0x144   :  { %v676_v54 = vpop.f32.mrb[0].mxu1 }
 0x145   :  { %v678_v55 = vpop.f32.mrb[1].mxu1 }
 0x146   :  { %v686_v56 = vcombine.low %v676_v54, %v678_v55 }
 0x148   :  { %690 = vst [vmem:[#allocation7 + $0x8] sm:$0x77] %v686_v56 }
 0x149   :  { %695 = vsyncadd [#allocation4], 64  ;;  %s818_s1 = smov [#allocation7]  }
 0x14a   :  { %s697_s5 = sshll.u32 %s818_s1, 4  ;;  %s698_s5 = int_to_ptr.vmem [resolvable:$true] %s697_s5 }
 0x14b   :  { %s784_s6 = scalar_lea.vmem %s698_s5, 192  ;;  %s788_s7 = scalar_lea.vmem %s698_s5, 256 }
 0x14c   :  { %p785_p2 = scmp.ne.s32.totalorder %s698_s5, %s784_s6  ;;  %p789_p3 = scmp.lt.s32.totalorder %s698_s5, %s698_s5 }
 0x14d   :  { %p790_p4 = scmp.lt.s32.totalorder %s788_s7, %s784_s6 }
 0x14f   :  { %p791_p5 = por %p790_p4, %p789_p3 }
 0x151   :  { %p792_p6 = pnand %p791_p5, %p785_p2 }
 0x153   :  { %795 = shalt.err (!%p792_p6)
}
 0x154   :  { %s796_s10 = scalar_lea.hbm %s1118_s2, 192 }
 0x155   :  { %p797_p7 = scmp.ne.s32.totalorder %s1118_s2, %s796_s10  ;;  %p800_p8 = scmp.lt.u32.totalorder %s796_s10, %s1118_s2 }
 0x157   :  { %p802_p9 = pnand %p800_p8, %p797_p7 }
 0x159   :  { %805 = shalt.err (!%p802_p9)
}
 0x15a   :  { %700 = dma.vmem_to_hbm [thread:$0]  %s698_s5, 192, %s1118_s2, [#allocation4]  }
 0x15b   :  { %810 = dma.done.wait [#allocation4], 256  }
 0x15c   :  { %811 = vsyncadd [#allocation4], 4294967040 }
 0x15d   :  { %704 = vsyncpa [#allocation3], 1 }
 0x15e   :  { %705 = vsyncpa [#allocation6], 1 }
 0x15f   :  { %706 = vsyncpa [#allocation4], 1 }

</bundles_post_ra>
